<compile_context>
chip_gen: v6e
topology: v6e:2x2x1
jax: 0.10.0
libtpu: 0.0.40
codegen_flags: <defaults>
</compile_context>

<pallas_src>
import functools

import jax
import jax.numpy as jnp
from jax import lax
from jax.experimental import pallas as pl
from jax.experimental.pallas import tpu as pltpu


def _round_up(n, m):
    return -(-n // m) * m


def _pad_to(x, shape):
    return jnp.pad(x, [(0, s - d) for d, s in zip(x.shape, shape)])


def rnn_recurrence_kernel(xp_ref, whh_ref, wout_ref, bout_ref, out_ref, *,
                          seq_len, batch):
    """tanh-RNN recurrence over pre-projected inputs + final classifier.

    xp_ref  : (L*Bp, Hp) f32   time-major pre-projected inputs (bias fused)
    whh_ref : (Hp, Hp)   bf16  hidden->hidden weight (zero-padded)
    wout_ref: (Hp, Cp)   bf16  classifier weight (zero-padded)
    bout_ref: (1, Cp)    f32   classifier bias (zero-padded)
    out_ref : (Bp, Cp)   f32   padded logits
    """
    whh = whh_ref[...]                               # load recurrent weight once
    hp = whh.shape[1]
    h0 = jnp.zeros((batch, hp), jnp.float32)         # h_0 = 0 (PyTorch default)

    def step(t, h):
        start = pl.multiple_of(t * batch, batch)     # sublane-aligned slice
        x_t = xp_ref[pl.ds(start, batch), :]         # (Bp, Hp) f32
        hh = jnp.dot(h.astype(jnp.bfloat16), whh,
                     preferred_element_type=jnp.float32)
        return jnp.tanh(x_t + hh)                    # elementwise chain in f32

    # TODO(synk): for L >> 32 drop unroll=True (or unroll a small factor) to
    # bound compile time; vreg pressure already stays flat via per-step pl.ds.
    h = lax.fori_loop(0, seq_len, step, h0, unroll=True)

    # TODO(synk): advanced — pin whh in MXU weight regs across timesteps via
    # pltpu.matmul_push_rhs / matmul_acc_lhs / matmul_pop and measure vs. this.
    out_ref[...] = (jnp.dot(h.astype(jnp.bfloat16), wout_ref[...],
                            preferred_element_type=jnp.float32)
                    + bout_ref[...])


def make_rnn_classifier(params):
    """One-time preprocessing; returns a jitted forward(batch_text_ids)."""
    emb = params["embedding"].astype(jnp.float32)        # (V, E)
    w_ih = params["w_ih"].astype(jnp.float32)            # (E, H)
    w_hh = params["w_hh"].astype(jnp.float32)            # (H, H)
    b_rnn = (params["b_ih"] + params["b_hh"]).astype(jnp.float32).reshape(1, -1)
    w_out = params["w_out"].astype(jnp.float32)          # (H, C)
    b_out = params["b_out"].astype(jnp.float32).reshape(1, -1)

    H = w_hh.shape[0]
    C = w_out.shape[1]
    Hp = _round_up(H, 128)
    Cp = _round_up(C, 128)

    # Fold the embedding lookup into the input projection (amortized across
    # all calls).  Padded H lanes are exactly 0, so they stay 0 through tanh.
    proj_table = _pad_to(emb @ w_ih + b_rnn, (emb.shape[0], Hp))   # (V, Hp) f32
    w_hh_p = _pad_to(w_hh, (Hp, Hp)).astype(jnp.bfloat16)
    w_out_p = _pad_to(w_out, (Hp, Cp)).astype(jnp.bfloat16)
    b_out_p = _pad_to(b_out, (1, Cp))                              # f32

    vmem = pl.BlockSpec(memory_space=pltpu.MemorySpace.VMEM)

    @jax.jit
    def forward(batch_text_ids):
        B, L = batch_text_ids.shape
        Bp = _round_up(B, 8)

        # Gather pre-projected rows directly in time-major layout.  Padded
        # batch rows reuse token 0; their (row-independent) hidden states are
        # sliced off below, so they cannot affect real logits.
        # TODO(synk): at production vocab/seq sizes keep proj_table in HBM
        # (BlockSpec(memory_space=pl.ANY)), scalar-prefetch the ids via
        # pltpu.PrefetchScalarGridSpec and DMA-gather rows inside the kernel.
        ids_tm = jnp.pad(batch_text_ids.T, ((0, 0), (0, Bp - B)))   # (L, Bp)
        xp = jnp.take(proj_table, ids_tm, axis=0).reshape(L * Bp, Hp)

        kernel = functools.partial(rnn_recurrence_kernel, seq_len=L, batch=Bp)
        # TODO(synk): for batch >> 8 add a batch-tiled grid with
        # dimension_semantics=("parallel",) (uses both v7x TCs) and set
        # vmem_limit_bytes explicitly, sized against v7x's 64 MiB VMEM.
        logits_p = pl.pallas_call(
            kernel,
            out_shape=jax.ShapeDtypeStruct((Bp, Cp), jnp.float32),
            in_specs=[vmem] * 4,
            out_specs=vmem,
        )(xp, w_hh_p, w_out_p, b_out_p)

        # Slice away padding, then output.squeeze() as in the reference.
        return jnp.squeeze(logits_p[:B, :C])

    return forward


def init_params(key, vocab_size, embed_dim, hidden_dim, num_classes):
    ks = jax.random.split(key, 7)
    scale = 0.1
    return {
        "embedding": scale * jax.random.normal(ks[0], (vocab_size, embed_dim), jnp.float32),
        "w_ih":      scale * jax.random.normal(ks[1], (embed_dim, hidden_dim), jnp.float32),
        "w_hh":      scale * jax.random.normal(ks[2], (hidden_dim, hidden_dim), jnp.float32),
        "b_ih":      scale * jax.random.normal(ks[3], (1, hidden_dim), jnp.float32),
        "b_hh":      scale * jax.random.normal(ks[4], (1, hidden_dim), jnp.float32),
        "w_out":     scale * jax.random.normal(ks[5], (hidden_dim, num_classes), jnp.float32),
        "b_out":     scale * jax.random.normal(ks[6], (1, num_classes), jnp.float32),
    }


if __name__ == "__main__":
    # Small shapes consistent with the module: batch=2, seq=8, embed=16,
    # hidden=32, num_classes=7, small synthetic vocab (tokenizer not loaded).
    B, L, E, H, C = 2, 8, 16, 32, 7
    VOCAB = 64  # stand-in for len(tokenizer)

    key = jax.random.PRNGKey(0)
    pkey, ikey = jax.random.split(key)
    params = init_params(pkey, VOCAB, E, H, C)
    batch_text_ids = jax.random.randint(ikey, (B, L), 0, VOCAB, dtype=jnp.int32)

    forward = make_rnn_classifier(params)      # one-time prep + jit
    logits = forward(batch_text_ids)
    jax.block_until_ready(logits)

    # Pure-JAX f32 reference of the same forward for a sanity check.
    def ref_forward(ids, p):
        emb = jnp.take(p["embedding"], ids, axis=0)  # (B, L, E)
        h = jnp.zeros((ids.shape[0], H), jnp.float32)
        for t in range(ids.shape[1]):
            h = jnp.tanh(emb[:, t, :] @ p["w_ih"] + p["b_ih"]
                         + h @ p["w_hh"] + p["b_hh"])
        return jnp.squeeze(h @ p["w_out"] + p["b_out"])

    ref = ref_forward(batch_text_ids, params)
    assert logits.shape == (B, C)
    # bf16 MXU operands (f32 accumulation) => slightly looser tolerance vs f32 ref.
    assert jnp.allclose(logits, ref, atol=2e-2, rtol=2e-2)

    print("KERNEL_OK")
</pallas_src>

<mosaic_0001>
module attributes {stable_mosaic.version = 11 : i64} {
  func.func @rnn_recurrence_kernel(%arg0: memref<64x128xf32, #tpu.memory_space<vmem>>, %arg1: memref<128x128xbf16, #tpu.memory_space<vmem>>, %arg2: memref<128x128xbf16, #tpu.memory_space<vmem>>, %arg3: memref<1x128xf32, #tpu.memory_space<vmem>>, %arg4: memref<8x128xf32, #tpu.memory_space<vmem>>) attributes {dimension_semantics = [], scalar_prefetch = 0 : i64, scratch_operands = 0 : i64, tpu.core_type = #tpu.core_type<tc>} {
    %c0 = arith.constant 0 : index
    %c0_0 = arith.constant 0 : index
    %0 = vector.load %arg1[%c0, %c0_0] : memref<128x128xbf16, #tpu.memory_space<vmem>>, vector<128x128xbf16>
    %cst = arith.constant 0.000000e+00 : f32
    %1 = vector.broadcast %cst : f32 to vector<8x128xf32>
    %c0_i32 = arith.constant 0 : i32
    %c8_i32 = arith.constant 8 : i32
    %2 = arith.muli %c0_i32, %c8_i32 : i32
    %3 = tpu.assume_multiple %2, 8 : i32
    %4 = arith.index_cast %3 : i32 to index
    %c0_1 = arith.constant 0 : index
    %5 = vector.load %arg0[%4, %c0_1] : memref<64x128xf32, #tpu.memory_space<vmem>>, vector<8x128xf32>
    %6 = arith.truncf %1 : vector<8x128xf32> to vector<8x128xbf16>
    %cst_2 = arith.constant dense<0.000000e+00> : vector<8x128xf32>
    %7 = tpu.matmul %6, %0, %cst_2 {dimension_numbers = #tpu.dot_dimension_numbers<[1], [0], [0], [1], [0, 0, 1, 1], [], []>} : vector<8x128xbf16>, vector<128x128xbf16>, vector<8x128xf32> -> vector<8x128xf32>
    %8 = arith.addf %5, %7 : vector<8x128xf32>
    %9 = math.tanh %8 : vector<8x128xf32>
    %c1_i32 = arith.constant 1 : i32
    %c8_i32_3 = arith.constant 8 : i32
    %10 = arith.muli %c1_i32, %c8_i32_3 : i32
    %11 = tpu.assume_multiple %10, 8 : i32
    %12 = arith.index_cast %11 : i32 to index
    %c0_4 = arith.constant 0 : index
    %13 = vector.load %arg0[%12, %c0_4] : memref<64x128xf32, #tpu.memory_space<vmem>>, vector<8x128xf32>
    %14 = arith.truncf %9 : vector<8x128xf32> to vector<8x128xbf16>
    %cst_5 = arith.constant dense<0.000000e+00> : vector<8x128xf32>
    %15 = tpu.matmul %14, %0, %cst_5 {dimension_numbers = #tpu.dot_dimension_numbers<[1], [0], [0], [1], [0, 0, 1, 1], [], []>} : vector<8x128xbf16>, vector<128x128xbf16>, vector<8x128xf32> -> vector<8x128xf32>
    %16 = arith.addf %13, %15 : vector<8x128xf32>
    %17 = math.tanh %16 : vector<8x128xf32>
    %c2_i32 = arith.constant 2 : i32
    %c8_i32_6 = arith.constant 8 : i32
    %18 = arith.muli %c2_i32, %c8_i32_6 : i32
    %19 = tpu.assume_multiple %18, 8 : i32
    %20 = arith.index_cast %19 : i32 to index
    %c0_7 = arith.constant 0 : index
    %21 = vector.load %arg0[%20, %c0_7] : memref<64x128xf32, #tpu.memory_space<vmem>>, vector<8x128xf32>
    %22 = arith.truncf %17 : vector<8x128xf32> to vector<8x128xbf16>
    %cst_8 = arith.constant dense<0.000000e+00> : vector<8x128xf32>
    %23 = tpu.matmul %22, %0, %cst_8 {dimension_numbers = #tpu.dot_dimension_numbers<[1], [0], [0], [1], [0, 0, 1, 1], [], []>} : vector<8x128xbf16>, vector<128x128xbf16>, vector<8x128xf32> -> vector<8x128xf32>
    %24 = arith.addf %21, %23 : vector<8x128xf32>
    %25 = math.tanh %24 : vector<8x128xf32>
    %c3_i32 = arith.constant 3 : i32
    %c8_i32_9 = arith.constant 8 : i32
    %26 = arith.muli %c3_i32, %c8_i32_9 : i32
    %27 = tpu.assume_multiple %26, 8 : i32
    %28 = arith.index_cast %27 : i32 to index
    %c0_10 = arith.constant 0 : index
    %29 = vector.load %arg0[%28, %c0_10] : memref<64x128xf32, #tpu.memory_space<vmem>>, vector<8x128xf32>
    %30 = arith.truncf %25 : vector<8x128xf32> to vector<8x128xbf16>
    %cst_11 = arith.constant dense<0.000000e+00> : vector<8x128xf32>
    %31 = tpu.matmul %30, %0, %cst_11 {dimension_numbers = #tpu.dot_dimension_numbers<[1], [0], [0], [1], [0, 0, 1, 1], [], []>} : vector<8x128xbf16>, vector<128x128xbf16>, vector<8x128xf32> -> vector<8x128xf32>
    %32 = arith.addf %29, %31 : vector<8x128xf32>
    %33 = math.tanh %32 : vector<8x128xf32>
    %c4_i32 = arith.constant 4 : i32
    %c8_i32_12 = arith.constant 8 : i32
    %34 = arith.muli %c4_i32, %c8_i32_12 : i32
    %35 = tpu.assume_multiple %34, 8 : i32
    %36 = arith.index_cast %35 : i32 to index
    %c0_13 = arith.constant 0 : index
    %37 = vector.load %arg0[%36, %c0_13] : memref<64x128xf32, #tpu.memory_space<vmem>>, vector<8x128xf32>
    %38 = arith.truncf %33 : vector<8x128xf32> to vector<8x128xbf16>
    %cst_14 = arith.constant dense<0.000000e+00> : vector<8x128xf32>
    %39 = tpu.matmul %38, %0, %cst_14 {dimension_numbers = #tpu.dot_dimension_numbers<[1], [0], [0], [1], [0, 0, 1, 1], [], []>} : vector<8x128xbf16>, vector<128x128xbf16>, vector<8x128xf32> -> vector<8x128xf32>
    %40 = arith.addf %37, %39 : vector<8x128xf32>
    %41 = math.tanh %40 : vector<8x128xf32>
    %c5_i32 = arith.constant 5 : i32
    %c8_i32_15 = arith.constant 8 : i32
    %42 = arith.muli %c5_i32, %c8_i32_15 : i32
    %43 = tpu.assume_multiple %42, 8 : i32
    %44 = arith.index_cast %43 : i32 to index
    %c0_16 = arith.constant 0 : index
    %45 = vector.load %arg0[%44, %c0_16] : memref<64x128xf32, #tpu.memory_space<vmem>>, vector<8x128xf32>
    %46 = arith.truncf %41 : vector<8x128xf32> to vector<8x128xbf16>
    %cst_17 = arith.constant dense<0.000000e+00> : vector<8x128xf32>
    %47 = tpu.matmul %46, %0, %cst_17 {dimension_numbers = #tpu.dot_dimension_numbers<[1], [0], [0], [1], [0, 0, 1, 1], [], []>} : vector<8x128xbf16>, vector<128x128xbf16>, vector<8x128xf32> -> vector<8x128xf32>
    %48 = arith.addf %45, %47 : vector<8x128xf32>
    %49 = math.tanh %48 : vector<8x128xf32>
    %c6_i32 = arith.constant 6 : i32
    %c8_i32_18 = arith.constant 8 : i32
    %50 = arith.muli %c6_i32, %c8_i32_18 : i32
    %51 = tpu.assume_multiple %50, 8 : i32
    %52 = arith.index_cast %51 : i32 to index
    %c0_19 = arith.constant 0 : index
    %53 = vector.load %arg0[%52, %c0_19] : memref<64x128xf32, #tpu.memory_space<vmem>>, vector<8x128xf32>
    %54 = arith.truncf %49 : vector<8x128xf32> to vector<8x128xbf16>
    %cst_20 = arith.constant dense<0.000000e+00> : vector<8x128xf32>
    %55 = tpu.matmul %54, %0, %cst_20 {dimension_numbers = #tpu.dot_dimension_numbers<[1], [0], [0], [1], [0, 0, 1, 1], [], []>} : vector<8x128xbf16>, vector<128x128xbf16>, vector<8x128xf32> -> vector<8x128xf32>
    %56 = arith.addf %53, %55 : vector<8x128xf32>
    %57 = math.tanh %56 : vector<8x128xf32>
    %c7_i32 = arith.constant 7 : i32
    %c8_i32_21 = arith.constant 8 : i32
    %58 = arith.muli %c7_i32, %c8_i32_21 : i32
    %59 = tpu.assume_multiple %58, 8 : i32
    %60 = arith.index_cast %59 : i32 to index
    %c0_22 = arith.constant 0 : index
    %61 = vector.load %arg0[%60, %c0_22] : memref<64x128xf32, #tpu.memory_space<vmem>>, vector<8x128xf32>
    %62 = arith.truncf %57 : vector<8x128xf32> to vector<8x128xbf16>
    %cst_23 = arith.constant dense<0.000000e+00> : vector<8x128xf32>
    %63 = tpu.matmul %62, %0, %cst_23 {dimension_numbers = #tpu.dot_dimension_numbers<[1], [0], [0], [1], [0, 0, 1, 1], [], []>} : vector<8x128xbf16>, vector<128x128xbf16>, vector<8x128xf32> -> vector<8x128xf32>
    %64 = arith.addf %61, %63 : vector<8x128xf32>
    %65 = math.tanh %64 : vector<8x128xf32>
    %c8_i32_24 = arith.constant 8 : i32
    %66 = arith.truncf %65 : vector<8x128xf32> to vector<8x128xbf16>
    %c0_25 = arith.constant 0 : index
    %c0_26 = arith.constant 0 : index
    %67 = vector.load %arg2[%c0_25, %c0_26] : memref<128x128xbf16, #tpu.memory_space<vmem>>, vector<128x128xbf16>
    %cst_27 = arith.constant dense<0.000000e+00> : vector<8x128xf32>
    %68 = tpu.matmul %66, %67, %cst_27 {dimension_numbers = #tpu.dot_dimension_numbers<[1], [0], [0], [1], [0, 0, 1, 1], [], []>} : vector<8x128xbf16>, vector<128x128xbf16>, vector<8x128xf32> -> vector<8x128xf32>
    %c0_28 = arith.constant 0 : index
    %c0_29 = arith.constant 0 : index
    %69 = vector.load %arg3[%c0_28, %c0_29] : memref<1x128xf32, #tpu.memory_space<vmem>>, vector<1x128xf32>
    %70 = vector.broadcast %69 : vector<1x128xf32> to vector<8x128xf32>
    %71 = arith.addf %68, %70 : vector<8x128xf32>
    %c0_30 = arith.constant 0 : index
    %c0_31 = arith.constant 0 : index
    %72 = vector.load %arg4[%c0_30, %c0_31] : memref<8x128xf32, #tpu.memory_space<vmem>>, vector<8x128xf32>
    tpu.vector_store %arg4[%c0_30, %c0_31], %71 {strides = array<i32>} : memref<8x128xf32, #tpu.memory_space<vmem>>, vector<8x128xf32>,
    return
  }
}

</mosaic_0001>

<bundles_post_ra>
// kernel: forward.1
= control target key start
LH: loop header
LB: loop body
LE: loop exit
PB: predicated region body
PF: predicated region fallthrough
CT: control target
= control target key end

     0   :  { %v877_v0 = vmov 0.0   ;;  %vm878_vm0 = vmmov 0   ;;  %v879_v9 = vmov 0   ;;  %s1153_s1 = inlined_call_operand.vmem [shape: bf16[128,128], index: 1, kind: input, shape index: {}]   ;;  %s1154_s0 = inlined_call_operand.vmem [shape: f32[64,128], index: 0, kind: input, shape index: {}]   ;;  %s1155_s2 = inlined_call_operand.vmem [shape: bf16[128,128], index: 2, kind: input, shape index: {}]   ;;  %s1156_s3 = inlined_call_operand.vmem [shape: f32[1,128], index: 3, kind: input, shape index: {}]   ;;  %s1157_s4 = inlined_call_operand.vmem [shape: f32[8,128], index: 4, kind: output, shape index: {}]  }
   0x1   :  { %662 = vmatprep.subr.bf16.mxu0 %v877_v0  ;;  %v909_v1 = vld [vmem:[%s1153_s1 + $0x38] sm:$0xff]   ;;  %678 = vmatprep.mubr.msk.bf16.mxu0 %vm878_vm0, %v877_v0  ;;  %v920_v2 = vld [vmem:[%s1153_s1 + $0x30] sm:$0xff]   ;;  %v929_v3 = vld [vmem:[%s1153_s1 + $0x28] sm:$0xff]  }
   0x2   :  { %682 = vmatprep.subr.bf16.mxu1 %v877_v0  ;;  %698 = vmatprep.mubr.msk.bf16.mxu1 %vm878_vm0, %v877_v0  ;;  %v938_v4 = vld [vmem:[%s1153_s1 + $0x20] sm:$0xff]   ;;  %v947_v5 = vld [vmem:[%s1153_s1 + $0x18] sm:$0xff]   ;;  %v956_v6 = vld [vmem:[%s1153_s1 + $0x10] sm:$0xff]  }
   0x3   :  { %663 = vmatpush3.bf16.msra.mxu0 %v909_v1  ;;  %683 = vmatpush3.bf16.msra.mxu1 %v909_v1  ;;  %v965_v7 = vld [vmem:[%s1153_s1 + $0x8] sm:$0xff]   ;;  %v974_v8 = vld [vmem:[%s1153_s1] sm:$0xff]   ;;  %v566_v26 = vld [vmem:[%s1154_s0 + $0x10] sm:$0xff] }
   0x4   :  { %664 = vmatprep.subr.bf16.mxu0 %v877_v0  ;;  %684 = vmatprep.subr.bf16.mxu1 %v877_v0  ;;  %v34_v10 = vld [vmem:[%s1154_s0] sm:$0xff]  ;;  %v565_v18 = vld [vmem:[%s1154_s0 + $0x8] sm:$0xff]  ;;  %v567_v34 = vld [vmem:[%s1154_s0 + $0x18] sm:$0xff] }
   0x5   :  { %v568_v42 = vld [vmem:[%s1154_s0 + $0x20] sm:$0xff]  ;;  %v569_v50 = vld [vmem:[%s1154_s0 + $0x28] sm:$0xff]  ;;  %v853_v58 = vld [vmem:[%s1155_s2 + $0x38] sm:$0xff]  }
   0x6   :  { %v854_v59 = vld [vmem:[%s1155_s2 + $0x30] sm:$0xff]   ;;  %v855_v60 = vld [vmem:[%s1155_s2 + $0x28] sm:$0xff]  }
   0x7   :  { %665 = vmatpush3.bf16.msra.mxu0 %v920_v2  ;;  %685 = vmatpush3.bf16.msra.mxu1 %v920_v2  ;;  %v570_v61 = vld [vmem:[%s1154_s0 + $0x30] sm:$0xff] }
   0x8   :  { %666 = vmatprep.subr.bf16.mxu0 %v877_v0  ;;  %686 = vmatprep.subr.bf16.mxu1 %v877_v0 }
   0xb   :  { %667 = vmatpush3.bf16.msra.mxu0 %v929_v3  ;;  %687 = vmatpush3.bf16.msra.mxu1 %v929_v3 }
   0xc   :  { %668 = vmatprep.subr.bf16.mxu0 %v877_v0  ;;  %688 = vmatprep.subr.bf16.mxu1 %v877_v0 }
   0xf   :  { %669 = vmatpush3.bf16.msra.mxu0 %v938_v4  ;;  %689 = vmatpush3.bf16.msra.mxu1 %v938_v4 }
  0x10   :  { %670 = vmatprep.subr.bf16.mxu0 %v877_v0  ;;  %690 = vmatprep.subr.bf16.mxu1 %v877_v0 }
  0x13   :  { %671 = vmatpush3.bf16.msra.mxu0 %v947_v5  ;;  %691 = vmatpush3.bf16.msra.mxu1 %v947_v5 }
  0x14   :  { %672 = vmatprep.subr.bf16.mxu0 %v877_v0  ;;  %692 = vmatprep.subr.bf16.mxu1 %v877_v0 }
  0x17   :  { %673 = vmatpush3.bf16.msra.mxu0 %v956_v6  ;;  %693 = vmatpush3.bf16.msra.mxu1 %v956_v6 }
  0x18   :  { %674 = vmatprep.subr.bf16.mxu0 %v877_v0  ;;  %694 = vmatprep.subr.bf16.mxu1 %v877_v0 }
  0x1b   :  { %675 = vmatpush3.bf16.msra.mxu0 %v965_v7  ;;  %695 = vmatpush3.bf16.msra.mxu1 %v965_v7 }
  0x1c   :  { %676 = vmatprep.subr.bf16.mxu0 %v877_v0  ;;  %696 = vmatprep.subr.bf16.mxu1 %v877_v0 }
  0x1f   :  { %677 = vmatpush3.bf16.msra.mxu0 %v974_v8  ;;  %697 = vmatpush3.bf16.msra.mxu1 %v974_v8 }
  0x20   :  { %702 = vmatprep.subr.bf16.mxu0 %v877_v0  ;;  %722 = vmatprep.subr.bf16.mxu1 %v877_v0 }
  0x22   :  { %679 = vmatmul.mubr.bf16.vlgmr.msra.gmra.mxu0 %v879_v9  ;;  %v859_v9 = vld [vmem:[%s1155_s2 + $0x8] sm:$0xff]  }
  0x23   :  { %703 = vmatpush3.bf16.msra.mxu0 %v909_v1  ;;  %718 = vmatprep.mubr.msk.bf16.mxu0 %vm878_vm0, %v877_v0 }
  0x24   :  { %704 = vmatprep.subr.bf16.mxu0 %v877_v0 }
  0x27   :  { %705 = vmatpush3.bf16.msra.mxu0 %v920_v2 }
  0x28   :  { %706 = vmatprep.subr.bf16.mxu0 %v877_v0 }
  0x2b   :  { %707 = vmatpush3.bf16.msra.mxu0 %v929_v3 }
  0x2c   :  { %708 = vmatprep.subr.bf16.mxu0 %v877_v0 }
  0x2f   :  { %709 = vmatpush3.bf16.msra.mxu0 %v938_v4 }
  0x30   :  { %710 = vmatprep.subr.bf16.mxu0 %v877_v0 }
  0x33   :  { %711 = vmatpush3.bf16.msra.mxu0 %v947_v5 }
  0x34   :  { %712 = vmatprep.subr.bf16.mxu0 %v877_v0 }
  0x37   :  { %713 = vmatpush3.bf16.msra.mxu0 %v956_v6 }
  0x38   :  { %714 = vmatprep.subr.bf16.mxu0 %v877_v0 }
  0x3b   :  { %715 = vmatpush3.bf16.msra.mxu0 %v965_v7 }
  0x3c   :  { %716 = vmatprep.subr.bf16.mxu0 %v877_v0 }
  0x3f   :  { %717 = vmatpush3.bf16.msra.mxu0 %v974_v8 }
  0x40   :  { %742 = vmatprep.subr.bf16.mxu0 %v877_v0 }
  0xe2   :  { %v117_v11 = vpop.f32.mrf.mxu0 }
  0xe3   :  { %v123_v12 = vadd.f32 %v117_v11, %v34_v10  ;;  %v860_v10 = vld [vmem:[%s1155_s2] sm:$0xff]   ;;  %v571_v11 = vld [vmem:[%s1154_s0 + $0x38] sm:$0xff] }
  0xe4   :  { %v680_v13 = vpop.f32.mrf.mxu0 }
  0xe5   :  { %861 = vtanh.f32 %v123_v12 }
  0xe6   :  { %v120_v14 = vpop.f32.mrf.mxu0 }
  0xe8   :  { %v681_v15 = vpop.f32.mrf.mxu0 }
  0xf2   :  { %v862_v16 = vpop.eup %861 }
  0xf3   :  { %v127_v17 = vpack.c.bf16 %v862_v16, %v862_v16 }
  0xf5   :  { %699 = vmatmul.mubr.bf16.vlgmr.msra.gmra.mxu1 %v127_v17 }
  0xf6   :  { %723 = vmatpush3.bf16.msra.mxu1 %v909_v1  ;;  %738 = vmatprep.mubr.msk.bf16.mxu1 %vm878_vm0, %v877_v0 }
  0xf7   :  { %724 = vmatprep.subr.bf16.mxu1 %v877_v0 }
  0xfa   :  { %725 = vmatpush3.bf16.msra.mxu1 %v920_v2 }
  0xfb   :  { %726 = vmatprep.subr.bf16.mxu1 %v877_v0 }
  0xfe   :  { %727 = vmatpush3.bf16.msra.mxu1 %v929_v3 }
  0xff   :  { %728 = vmatprep.subr.bf16.mxu1 %v877_v0 }
 0x102   :  { %729 = vmatpush3.bf16.msra.mxu1 %v938_v4 }
 0x103   :  { %730 = vmatprep.subr.bf16.mxu1 %v877_v0 }
 0x106   :  { %731 = vmatpush3.bf16.msra.mxu1 %v947_v5 }
 0x107   :  { %732 = vmatprep.subr.bf16.mxu1 %v877_v0 }
 0x10a   :  { %733 = vmatpush3.bf16.msra.mxu1 %v956_v6 }
 0x10b   :  { %734 = vmatprep.subr.bf16.mxu1 %v877_v0 }
 0x10e   :  { %735 = vmatpush3.bf16.msra.mxu1 %v965_v7 }
 0x10f   :  { %736 = vmatprep.subr.bf16.mxu1 %v877_v0 }
 0x112   :  { %737 = vmatpush3.bf16.msra.mxu1 %v974_v8 }
 0x113   :  { %762 = vmatprep.subr.bf16.mxu1 %v877_v0 }
 0x1b5   :  { %v162_v19 = vpop.f32.mrf.mxu1 }
 0x1b6   :  { %v168_v20 = vadd.f32 %v565_v18, %v162_v19 }
 0x1b7   :  { %v700_v21 = vpop.f32.mrf.mxu1 }
 0x1b8   :  { %863 = vtanh.f32 %v168_v20 }
 0x1b9   :  { %v165_v22 = vpop.f32.mrf.mxu1 }
 0x1bb   :  { %v701_v23 = vpop.f32.mrf.mxu1 }
 0x1c5   :  { %v864_v24 = vpop.eup %863 }
 0x1c6   :  { %v172_v25 = vpack.c.bf16 %v864_v24, %v864_v24 }
 0x1c8   :  { %719 = vmatmul.mubr.bf16.vlgmr.msra.gmra.mxu0 %v172_v25 }
 0x1c9   :  { %743 = vmatpush3.bf16.msra.mxu0 %v909_v1  ;;  %758 = vmatprep.mubr.msk.bf16.mxu0 %vm878_vm0, %v877_v0 }
 0x1ca   :  { %744 = vmatprep.subr.bf16.mxu0 %v877_v0 }
 0x1cd   :  { %745 = vmatpush3.bf16.msra.mxu0 %v920_v2 }
 0x1ce   :  { %746 = vmatprep.subr.bf16.mxu0 %v877_v0 }
 0x1d1   :  { %747 = vmatpush3.bf16.msra.mxu0 %v929_v3 }
 0x1d2   :  { %748 = vmatprep.subr.bf16.mxu0 %v877_v0 }
 0x1d5   :  { %749 = vmatpush3.bf16.msra.mxu0 %v938_v4 }
 0x1d6   :  { %750 = vmatprep.subr.bf16.mxu0 %v877_v0 }
 0x1d9   :  { %751 = vmatpush3.bf16.msra.mxu0 %v947_v5 }
 0x1da   :  { %752 = vmatprep.subr.bf16.mxu0 %v877_v0 }
 0x1dd   :  { %753 = vmatpush3.bf16.msra.mxu0 %v956_v6 }
 0x1de   :  { %754 = vmatprep.subr.bf16.mxu0 %v877_v0 }
 0x1e1   :  { %755 = vmatpush3.bf16.msra.mxu0 %v965_v7 }
 0x1e2   :  { %756 = vmatprep.subr.bf16.mxu0 %v877_v0 }
 0x1e5   :  { %757 = vmatpush3.bf16.msra.mxu0 %v974_v8 }
 0x1e6   :  { %782 = vmatprep.subr.bf16.mxu0 %v877_v0 }
 0x288   :  { %v207_v27 = vpop.f32.mrf.mxu0 }
 0x289   :  { %v213_v28 = vadd.f32 %v566_v26, %v207_v27 }
 0x28a   :  { %v720_v29 = vpop.f32.mrf.mxu0 }
 0x28b   :  { %865 = vtanh.f32 %v213_v28 }
 0x28c   :  { %v210_v30 = vpop.f32.mrf.mxu0 }
 0x28e   :  { %v721_v31 = vpop.f32.mrf.mxu0 }
 0x298   :  { %v866_v32 = vpop.eup %865 }
 0x299   :  { %v217_v33 = vpack.c.bf16 %v866_v32, %v866_v32 }
 0x29b   :  { %739 = vmatmul.mubr.bf16.vlgmr.msra.gmra.mxu1 %v217_v33 }
 0x29c   :  { %763 = vmatpush3.bf16.msra.mxu1 %v909_v1  ;;  %778 = vmatprep.mubr.msk.bf16.mxu1 %vm878_vm0, %v877_v0 }
 0x29d   :  { %764 = vmatprep.subr.bf16.mxu1 %v877_v0 }
 0x2a0   :  { %765 = vmatpush3.bf16.msra.mxu1 %v920_v2 }
 0x2a1   :  { %766 = vmatprep.subr.bf16.mxu1 %v877_v0 }
 0x2a4   :  { %767 = vmatpush3.bf16.msra.mxu1 %v929_v3 }
 0x2a5   :  { %768 = vmatprep.subr.bf16.mxu1 %v877_v0 }
 0x2a8   :  { %769 = vmatpush3.bf16.msra.mxu1 %v938_v4 }
 0x2a9   :  { %770 = vmatprep.subr.bf16.mxu1 %v877_v0 }
 0x2ac   :  { %771 = vmatpush3.bf16.msra.mxu1 %v947_v5 }
 0x2ad   :  { %772 = vmatprep.subr.bf16.mxu1 %v877_v0 }
 0x2b0   :  { %773 = vmatpush3.bf16.msra.mxu1 %v956_v6 }
 0x2b1   :  { %774 = vmatprep.subr.bf16.mxu1 %v877_v0 }
 0x2b4   :  { %775 = vmatpush3.bf16.msra.mxu1 %v965_v7 }
 0x2b5   :  { %776 = vmatprep.subr.bf16.mxu1 %v877_v0 }
 0x2b8   :  { %777 = vmatpush3.bf16.msra.mxu1 %v974_v8 }
 0x2b9   :  { %802 = vmatprep.subr.bf16.mxu1 %v877_v0 }
 0x35b   :  { %v252_v35 = vpop.f32.mrf.mxu1 }
 0x35c   :  { %v258_v36 = vadd.f32 %v567_v34, %v252_v35 }
 0x35d   :  { %v740_v37 = vpop.f32.mrf.mxu1 }
 0x35e   :  { %867 = vtanh.f32 %v258_v36 }
 0x35f   :  { %v255_v38 = vpop.f32.mrf.mxu1 }
 0x361   :  { %v741_v39 = vpop.f32.mrf.mxu1 }
 0x36b   :  { %v868_v40 = vpop.eup %867 }
 0x36c   :  { %v262_v41 = vpack.c.bf16 %v868_v40, %v868_v40 }
 0x36e   :  { %759 = vmatmul.mubr.bf16.vlgmr.msra.gmra.mxu0 %v262_v41 }
 0x36f   :  { %783 = vmatpush3.bf16.msra.mxu0 %v909_v1  ;;  %798 = vmatprep.mubr.msk.bf16.mxu0 %vm878_vm0, %v877_v0 }
 0x370   :  { %784 = vmatprep.subr.bf16.mxu0 %v877_v0 }
 0x373   :  { %785 = vmatpush3.bf16.msra.mxu0 %v920_v2 }
 0x374   :  { %786 = vmatprep.subr.bf16.mxu0 %v877_v0 }
 0x377   :  { %787 = vmatpush3.bf16.msra.mxu0 %v929_v3 }
 0x378   :  { %788 = vmatprep.subr.bf16.mxu0 %v877_v0 }
 0x37b   :  { %789 = vmatpush3.bf16.msra.mxu0 %v938_v4 }
 0x37c   :  { %790 = vmatprep.subr.bf16.mxu0 %v877_v0 }
 0x37f   :  { %791 = vmatpush3.bf16.msra.mxu0 %v947_v5 }
 0x380   :  { %792 = vmatprep.subr.bf16.mxu0 %v877_v0 }
 0x383   :  { %793 = vmatpush3.bf16.msra.mxu0 %v956_v6 }
 0x384   :  { %794 = vmatprep.subr.bf16.mxu0 %v877_v0 }
 0x387   :  { %795 = vmatpush3.bf16.msra.mxu0 %v965_v7 }
 0x388   :  { %796 = vmatprep.subr.bf16.mxu0 %v877_v0 }
 0x38b   :  { %797 = vmatpush3.bf16.msra.mxu0 %v974_v8 }
 0x38c   :  { %822 = vmatprep.subr.bf16.mxu0 %v877_v0 }
 0x42e   :  { %v297_v43 = vpop.f32.mrf.mxu0 }
 0x42f   :  { %v303_v44 = vadd.f32 %v568_v42, %v297_v43 }
 0x430   :  { %v760_v45 = vpop.f32.mrf.mxu0 }
 0x431   :  { %869 = vtanh.f32 %v303_v44 }
 0x432   :  { %v300_v46 = vpop.f32.mrf.mxu0 }
 0x434   :  { %v761_v47 = vpop.f32.mrf.mxu0 }
 0x43e   :  { %v870_v48 = vpop.eup %869 }
 0x43f   :  { %v307_v49 = vpack.c.bf16 %v870_v48, %v870_v48 }
 0x441   :  { %779 = vmatmul.mubr.bf16.vlgmr.msra.gmra.mxu1 %v307_v49 }
 0x442   :  { %803 = vmatpush3.bf16.msra.mxu1 %v909_v1  ;;  %818 = vmatprep.mubr.msk.bf16.mxu1 %vm878_vm0, %v877_v0 }
 0x443   :  { %804 = vmatprep.subr.bf16.mxu1 %v877_v0 }
 0x446   :  { %805 = vmatpush3.bf16.msra.mxu1 %v920_v2 }
 0x447   :  { %806 = vmatprep.subr.bf16.mxu1 %v877_v0 }
 0x44a   :  { %807 = vmatpush3.bf16.msra.mxu1 %v929_v3 }
 0x44b   :  { %808 = vmatprep.subr.bf16.mxu1 %v877_v0 }
 0x44e   :  { %809 = vmatpush3.bf16.msra.mxu1 %v938_v4 }
 0x44f   :  { %810 = vmatprep.subr.bf16.mxu1 %v877_v0 }
 0x452   :  { %811 = vmatpush3.bf16.msra.mxu1 %v947_v5 }
 0x453   :  { %812 = vmatprep.subr.bf16.mxu1 %v877_v0 }
 0x456   :  { %813 = vmatpush3.bf16.msra.mxu1 %v956_v6  ;;  %v856_v6 = vld [vmem:[%s1155_s2 + $0x20] sm:$0xff]  }
 0x457   :  { %814 = vmatprep.subr.bf16.mxu1 %v877_v0 }
 0x45a   :  { %815 = vmatpush3.bf16.msra.mxu1 %v965_v7  ;;  %v857_v7 = vld [vmem:[%s1155_s2 + $0x18] sm:$0xff]  }
 0x45b   :  { %816 = vmatprep.subr.bf16.mxu1 %v877_v0 }
 0x45e   :  { %817 = vmatpush3.bf16.msra.mxu1 %v974_v8  ;;  %v858_v8 = vld [vmem:[%s1155_s2 + $0x10] sm:$0xff]  }
 0x501   :  { %v342_v51 = vpop.f32.mrf.mxu1 }
 0x502   :  { %v348_v52 = vadd.f32 %v569_v50, %v342_v51 }
 0x503   :  { %v780_v53 = vpop.f32.mrf.mxu1 }
 0x504   :  { %871 = vtanh.f32 %v348_v52 }
 0x505   :  { %v345_v54 = vpop.f32.mrf.mxu1 }
 0x507   :  { %v781_v55 = vpop.f32.mrf.mxu1 }
 0x511   :  { %v872_v56 = vpop.eup %871 }
 0x512   :  { %v352_v57 = vpack.c.bf16 %v872_v56, %v872_v56 }
 0x514   :  { %799 = vmatmul.mubr.bf16.vlgmr.msra.gmra.mxu0 %v352_v57 }
 0x515   :  { %838 = vmatprep.mubr.msk.bf16.mxu0 %vm878_vm0, %v877_v0  ;;  %823 = vmatpush3.bf16.msra.mxu0 %v853_v58 }
 0x516   :  { %824 = vmatprep.subr.bf16.mxu0 %v877_v0 }
 0x519   :  { %825 = vmatpush3.bf16.msra.mxu0 %v854_v59 }
 0x51a   :  { %826 = vmatprep.subr.bf16.mxu0 %v877_v0 }
 0x51d   :  { %827 = vmatpush3.bf16.msra.mxu0 %v855_v60 }
 0x51e   :  { %828 = vmatprep.subr.bf16.mxu0 %v877_v0 }
 0x521   :  { %829 = vmatpush3.bf16.msra.mxu0 %v856_v6 }
 0x522   :  { %830 = vmatprep.subr.bf16.mxu0 %v877_v0 }
 0x525   :  { %831 = vmatpush3.bf16.msra.mxu0 %v857_v7 }
 0x526   :  { %832 = vmatprep.subr.bf16.mxu0 %v877_v0 }
 0x529   :  { %833 = vmatpush3.bf16.msra.mxu0 %v858_v8 }
 0x52a   :  { %834 = vmatprep.subr.bf16.mxu0 %v877_v0 }
 0x52d   :  { %835 = vmatpush3.bf16.msra.mxu0 %v859_v9 }
 0x52e   :  { %836 = vmatprep.subr.bf16.mxu0 %v877_v0  ;;  %v572_v0 = vld [vmem:[%s1156_s3] ss:$0 sm:$0xff] }
 0x531   :  { %837 = vmatpush3.bf16.msra.mxu0 %v860_v10 }
 0x5d4   :  { %v387_v62 = vpop.f32.mrf.mxu0 }
 0x5d5   :  { %v393_v63 = vadd.f32 %v570_v61, %v387_v62 }
 0x5d6   :  { %v800_v1 = vpop.f32.mrf.mxu0 }
 0x5d7   :  { %873 = vtanh.f32 %v393_v63 }
 0x5d8   :  { %v390_v2 = vpop.f32.mrf.mxu0 }
 0x5da   :  { %v801_v3 = vpop.f32.mrf.mxu0 }
 0x5e4   :  { %v874_v4 = vpop.eup %873 }
 0x5e5   :  { %v397_v5 = vpack.c.bf16 %v874_v4, %v874_v4 }
 0x5e7   :  { %819 = vmatmul.mubr.bf16.vlgmr.msra.gmra.mxu1 %v397_v5 }
 0x6a7   :  { %v432_v12 = vpop.f32.mrf.mxu1 }
 0x6a8   :  { %v438_v13 = vadd.f32 %v571_v11, %v432_v12 }
 0x6a9   :  { %v820_v14 = vpop.f32.mrf.mxu1 }
 0x6aa   :  { %875 = vtanh.f32 %v438_v13 }
 0x6ab   :  { %v435_v15 = vpop.f32.mrf.mxu1 }
 0x6ad   :  { %v821_v16 = vpop.f32.mrf.mxu1 }
 0x6b7   :  { %v876_v17 = vpop.eup %875 }
 0x6b8   :  { %v440_v18 = vpack.c.bf16 %v876_v17, %v876_v17 }
 0x6ba   :  { %839 = vmatmul.mubr.bf16.vlgmr.msra.gmra.mxu0 %v440_v18 }
 0x77a   :  { %v546_v19 = vpop.f32.mrf.mxu0 }
 0x77b   :  { %v547_v20 = vadd.f32 %v572_v0, %v546_v19 }
 0x77c   :  { %v840_v21 = vpop.f32.mrf.mxu0 }
 0x77d   :  { %552 = vst [vmem:[%s1157_s4] sm:$0xff] %v547_v20 }
 0x77e   :  { %v549_v22 = vpop.f32.mrf.mxu0 }
 0x780   :  { %v841_v23 = vpop.f32.mrf.mxu0 }

</bundles_post_ra>
